<compile_context>
chip_gen: v6e
topology: v6e:2x2x1
jax: 0.10.0
libtpu: 0.0.40
codegen_flags: <defaults>
</compile_context>

<pallas_src>
import math

import jax
import jax.numpy as jnp
from jax.experimental import pallas as pl
from jax.experimental.pallas import tpu as pltpu


# ----------------------------- Pallas kernel ------------------------------- #

_LANE_CHUNK = 256   # lanes per inner lerp/matmul chunk: bounds live vregs
                    # ((32,256) f32 slab = 8 vregs) while staying lane-dense.


def _grid_kernel(frac_ref, feats_ref, wt_ref, out_ref):
    """One grid step = one tile of N points ("parallel" axis).

      frac_ref : (3, L, tN)   f32   per-level fractional coords, N on lanes
      feats_ref: (8, K, tN)   bf16  gathered corner features, K = F*L, row = f*L + l
      wt_ref   : (D_out, K)   f32   Linear weight, columns permuted to f*L + l
      out_ref  : (D_out, tN)  f32   lane-dense output tile
    """
    K = feats_ref.shape[1]
    L = frac_ref.shape[1]
    F = K // L
    tn = out_ref.shape[1]
    ch = _LANE_CHUNK

    w = wt_ref[...]                                   # (D_out, K), tiny, resident

    @pl.loop(0, tn // ch)                             # strip-mine lanes: bound vregs
    def _(ci):
        s = pl.ds(pl.multiple_of(ci * ch, ch), ch)

        # frac rows are (L, ch); replicate to the (K = F*L, ch) feature rows.
        # Sublane offsets 0 and L=16 are 8-aligned -> cheap aligned copy.
        fx = jnp.concatenate([frac_ref[0, :, s]] * F, axis=0)
        fy = jnp.concatenate([frac_ref[1, :, s]] * F, axis=0)
        fz = jnp.concatenate([frac_ref[2, :, s]] * F, axis=0)

        c = [feats_ref[i, :, s].astype(jnp.float32) for i in range(8)]  # 8 x (K, ch)

        # trilinear interpolation as 7 lerps over full (K, ch) slabs
        # corner bit 0 = x offset, bit 1 = y, bit 2 = z (matches the gather glue)
        c00 = c[0] + fx * (c[1] - c[0])
        c10 = c[2] + fx * (c[3] - c[2])
        c01 = c[4] + fx * (c[5] - c[4])
        c11 = c[6] + fx * (c[7] - c[6])
        c0 = c00 + fy * (c10 - c00)
        c1 = c01 + fy * (c11 - c01)
        interp = c0 + fz * (c1 - c0)                  # (K, ch)

        # single M=D_out, K=L*F matmul per chunk; lane-dense (D_out, ch) store
        out_ref[:, s] = jnp.dot(w, interp, preferred_element_type=jnp.float32)


def _round_up(x, m):
    return -(-x // m) * m


def grid_mlp_pallas(frac, corner_feats, wt, *, tile_n=2048):
    """frac: (3,L,N) f32, corner_feats: (8,F*L,N) bf16, wt: (D_out, F*L) f32.

    Returns (D_out, N) f32 (lane-dense; caller transposes if needed)."""
    _, L, N = frac.shape
    K = corner_feats.shape[1]
    D_out = wt.shape[0]
    ch = _LANE_CHUNK

    # Pick the largest useful, chunk-aligned tile (no padding of the inputs:
    # the partial last tile reads garbage lanes that never mix across lanes and
    # whose writeback is masked by Pallas).  VMEM at tile_n=2048 is ~3 MiB
    # double-buffered, well under every generation's scoped-VMEM default.
    tile_n = max(ch, min(_round_up(tile_n, ch), _round_up(N, ch)))

    out = pl.pallas_call(
        _grid_kernel,
        out_shape=jax.ShapeDtypeStruct((D_out, N), jnp.float32),
        grid_spec=pltpu.PrefetchScalarGridSpec(
            num_scalar_prefetch=0,
            grid=(pl.cdiv(N, tile_n),),
            in_specs=[
                pl.BlockSpec((3, L, tile_n), lambda i: (0, 0, i)),
                pl.BlockSpec((8, K, tile_n), lambda i: (0, 0, i)),
                # weight: one untiled block, constant index map (stays resident)
                pl.BlockSpec((D_out, K), lambda i: (0, 0)),
            ],
            out_specs=pl.BlockSpec((D_out, tile_n), lambda i: (0, i)),
        ),
        compiler_params=pltpu.CompilerParams(
            dimension_semantics=("parallel",)),
    )(frac, corner_feats, wt)
    return out


# --------------------------- hash-grid glue (JAX) --------------------------- #

_PRIMES = (1, 2654435761, 805459861)   # torch-ngp fast_hash primes


def make_hashgrid_params(key, input_dim=3, num_levels=16, level_dim=2,
                         log2_hashmap_size=19, base_resolution=16,
                         desired_resolution=513, table_dtype=jnp.bfloat16):
    """Deterministic synthetic hash-grid tables (uniform(-1e-4, 1e-4)).

    Tables are stored in bf16 to halve the bandwidth of the dominant
    corner-feature traffic (gather writeback + kernel read)."""
    per_level_scale = 2.0 ** (math.log2(desired_resolution / base_resolution)
                              / (num_levels - 1))
    max_params = 2 ** log2_hashmap_size
    scales, resolutions, sizes, tables = [], [], [], []
    for l in range(num_levels):
        scale = base_resolution * (per_level_scale ** l) - 1.0   # align_corners
        resolution = int(math.ceil(scale)) + 1
        params_in_level = min(max_params, resolution ** input_dim)
        params_in_level = int(math.ceil(params_in_level / 8) * 8)
        key, sub = jax.random.split(key)
        tbl = jax.random.uniform(sub, (params_in_level, level_dim),
                                 jnp.float32, minval=-1e-4, maxval=1e-4)
        scales.append(scale)
        resolutions.append(resolution)
        sizes.append(params_in_level)
        tables.append(tbl.astype(table_dtype))
    return scales, resolutions, sizes, tables


def hashgrid_frac_and_gather(xyz01, scales, resolutions, sizes, tables):
    """xyz01: (N,3) in [0,1] -> frac (3,L,N) f32, corner feats (8,F*L,N) bf16.

    Outputs are produced directly in the kernel's lane-dense (N-last),
    sublane-dense (all levels fused, feature-major f*L+l rows) layout."""
    fracs, level_feats = [], []
    for scale, res, size, tbl in zip(scales, resolutions, sizes, tables):
        pos = xyz01 * jnp.float32(scale)          # align_corners=True
        pos_floor = jnp.floor(pos)
        frac = pos - pos_floor                    # (N, 3)
        pos_grid = pos_floor.astype(jnp.uint32)
        use_hash = (res ** 3) > size
        tbl_t = tbl.T                             # (F, size)
        corners = []
        for c in range(8):
            idx = [pos_grid[:, d] + jnp.uint32((c >> d) & 1) for d in range(3)]
            if use_hash:
                index = (idx[0] * jnp.uint32(_PRIMES[0])
                         ^ idx[1] * jnp.uint32(_PRIMES[1])
                         ^ idx[2] * jnp.uint32(_PRIMES[2])) % jnp.uint32(size)
            else:
                idx = [jnp.minimum(i, jnp.uint32(res - 1)) for i in idx]
                index = (idx[0] + idx[1] * jnp.uint32(res)
                         + idx[2] * jnp.uint32(res * res)) % jnp.uint32(size)
            # TODO(synk): gather stays in XLA (no clean Pallas TPU large-table gather).
            corners.append(jnp.take(tbl_t, index.astype(jnp.int32), axis=1))  # (F, N)
        fracs.append(frac.T)                                   # (3, N)
        level_feats.append(jnp.stack(corners, axis=0))         # (8, F, N)

    frac_all = jnp.stack(fracs, axis=1)                        # (3, L, N)
    feats_all = jnp.stack(level_feats, axis=2)                 # (8, F, L, N)
    F, L, N = feats_all.shape[1], feats_all.shape[2], feats_all.shape[3]
    feats_all = feats_all.reshape(8, F * L, N)                 # row = f*L + l
    return frac_all, feats_all


def grid_forward(xyz, bound, enc_params, w_torch, *, tile_n=2048):
    """Grid.forward: xyz -> normalize -> hashgrid encode -> Linear(no bias)."""
    xyz01 = (xyz + bound) / (2.0 * bound)
    frac, feats = hashgrid_frac_and_gather(xyz01, *enc_params)
    L = frac.shape[1]
    F = feats.shape[1] // L
    # torch-ngp encoder output is level-major (col = l*F + f); the kernel's
    # interp rows are feature-major (row = f*L + l) -> permute weight columns once.
    perm = jnp.array([l * F + f for f in range(F) for l in range(L)], jnp.int32)
    w_perm = jnp.take(w_torch, perm, axis=1)
    out_t = grid_mlp_pallas(frac, feats, w_perm, tile_n=tile_n)  # (D_out, N)
    return out_t.T                                               # (N, D_out)


# ------------------------------ pure-JAX ref -------------------------------- #

def grid_forward_ref(xyz, bound, enc_params, w_torch):
    xyz01 = (xyz + bound) / (2.0 * bound)
    frac, feats = hashgrid_frac_and_gather(xyz01, *enc_params)  # (3,L,N),(8,F*L,N)
    _, L, N = frac.shape
    K = feats.shape[1]
    F = K // L
    feats4 = feats.astype(jnp.float32).reshape(8, F, L, N)
    bits = jnp.array([[(c >> d) & 1 for d in range(3)] for c in range(8)],
                     jnp.float32)                                # (8, 3)
    w = jnp.prod(jnp.where(bits[:, :, None, None] == 1.0,
                           frac[None, :, :, :], 1.0 - frac[None, :, :, :]),
                 axis=1)                                         # (8, L, N)
    interp = jnp.sum(w[:, None, :, :] * feats4, axis=0)          # (F, L, N)
    encoded = interp.transpose(2, 1, 0).reshape(N, L * F)        # col = l*F + f
    return encoded @ w_torch.T                                   # (N, D_out)


# ----------------------------------- main ----------------------------------- #

if __name__ == "__main__":
    key = jax.random.PRNGKey(0)
    k_pts, k_enc, k_w = jax.random.split(key, 3)

    # Grid(...) defaults: level_dim=2, num_levels=16, log2_hashmap_size=19,
    # desired_resolution=512 (encoder gets 512+1), output_dim=8, linear interp.
    num_levels, level_dim = 16, 2
    log2_hashmap_size, desired_resolution = 19, 512
    output_dim = 8
    in_dim = num_levels * level_dim       # 32

    N = 1000                              # non-multiple of the lane chunk:
                                          # exercises the pad-free partial tile
    bound = 1.0
    xyz = jax.random.uniform(k_pts, (N, 3), jnp.float32,
                             minval=-bound, maxval=bound)

    enc_params = make_hashgrid_params(
        k_enc, input_dim=3, num_levels=num_levels, level_dim=level_dim,
        log2_hashmap_size=log2_hashmap_size, base_resolution=16,
        desired_resolution=desired_resolution + 1)

    # MLP(in_dim, output_dim, 0, 1, bias=False) == single Linear, no bias, no relu.
    lim = 1.0 / math.sqrt(in_dim)
    w_torch = jax.random.uniform(k_w, (output_dim, in_dim), jnp.float32,
                                 minval=-lim, maxval=lim)   # PyTorch (out, in)

    out = grid_forward(xyz, bound, enc_params, w_torch, tile_n=2048)
    out = jax.block_until_ready(out)

    ref = grid_forward_ref(xyz, bound, enc_params, w_torch)
    assert out.shape == (N, output_dim)
    max_err = float(jnp.max(jnp.abs(out - ref)))
    assert jnp.allclose(out, ref, atol=2e-6, rtol=1e-3), max_err

    print("KERNEL_OK")
</pallas_src>

<mosaic_0001>
module attributes {stable_mosaic.version = 11 : i64} {
  func.func @_grid_kernel(%arg0: i32, %arg1: memref<3x16x1024xf32, #tpu.memory_space<vmem>>, %arg2: memref<8x32x1024xbf16, #tpu.memory_space<vmem>>, %arg3: memref<8x32xf32, #tpu.memory_space<vmem>>, %arg4: memref<8x1024xf32, #tpu.memory_space<vmem>>) attributes {dimension_semantics = [#tpu.dimension_semantics<parallel>], iteration_bounds = array<i64: 1>, scalar_prefetch = 0 : i64, scratch_operands = 0 : i64, tpu.core_type = #tpu.core_type<tc>, window_params = [{transform_indices = @transform_0, window_bounds = array<i64: 3, 16, 1024>}, {transform_indices = @transform_1, window_bounds = array<i64: 8, 32, 1024>}, {pipeline_mode = #tpu.pipeline_mode<synchronous>, transform_indices = @transform_2, window_bounds = array<i64: 8, 32>}, {transform_indices = @transform_3, window_bounds = array<i64: 8, 1024>}]} {
    %c0 = arith.constant 0 : index
    %c0_0 = arith.constant 0 : index
    %0 = vector.load %arg3[%c0, %c0_0] : memref<8x32xf32, #tpu.memory_space<vmem>>, vector<8x32xf32>
    %c0_i32 = arith.constant 0 : i32
    %c4_i32 = arith.constant 4 : i32
    %1 = arith.addi %c0_i32, %c4_i32 : i32
    %c1_i32 = arith.constant 1 : i32
    scf.for %arg5 = %c0_i32 to %1 step %c1_i32  : i32 {
      %c1_i32_2 = arith.constant 1 : i32
      %2 = arith.muli %arg5, %c1_i32_2 : i32
      %c0_i32_3 = arith.constant 0 : i32
      %3 = arith.addi %c0_i32_3, %2 : i32
      %c256_i32 = arith.constant 256 : i32
      %4 = arith.muli %3, %c256_i32 : i32
      %5 = tpu.assume_multiple %4, 256 : i32
      %c0_4 = arith.constant 0 : index
      %c0_5 = arith.constant 0 : index
      %6 = arith.index_cast %5 : i32 to index
      %7 = vector.load %arg1[%c0_4, %c0_5, %6] : memref<3x16x1024xf32, #tpu.memory_space<vmem>>, vector<1x16x256xf32>
      %8 = vector.shape_cast %7 : vector<1x16x256xf32> to vector<16x256xf32>
      %9 = tpu.concatenate %8, %8 in 0 : vector<16x256xf32>, vector<16x256xf32> -> vector<32x256xf32>
      %c1 = arith.constant 1 : index
      %c0_6 = arith.constant 0 : index
      %10 = arith.index_cast %5 : i32 to index
      %11 = vector.load %arg1[%c1, %c0_6, %10] : memref<3x16x1024xf32, #tpu.memory_space<vmem>>, vector<1x16x256xf32>
      %12 = vector.shape_cast %11 : vector<1x16x256xf32> to vector<16x256xf32>
      %13 = tpu.concatenate %12, %12 in 0 : vector<16x256xf32>, vector<16x256xf32> -> vector<32x256xf32>
      %c2 = arith.constant 2 : index
      %c0_7 = arith.constant 0 : index
      %14 = arith.index_cast %5 : i32 to index
      %15 = vector.load %arg1[%c2, %c0_7, %14] : memref<3x16x1024xf32, #tpu.memory_space<vmem>>, vector<1x16x256xf32>
      %16 = vector.shape_cast %15 : vector<1x16x256xf32> to vector<16x256xf32>
      %17 = tpu.concatenate %16, %16 in 0 : vector<16x256xf32>, vector<16x256xf32> -> vector<32x256xf32>
      %c0_8 = arith.constant 0 : index
      %c0_9 = arith.constant 0 : index
      %18 = arith.index_cast %5 : i32 to index
      %19 = vector.load %arg2[%c0_8, %c0_9, %18] : memref<8x32x1024xbf16, #tpu.memory_space<vmem>>, vector<1x32x256xbf16>
      %20 = vector.shape_cast %19 : vector<1x32x256xbf16> to vector<32x256xbf16>
      %21 = arith.extf %20 : vector<32x256xbf16> to vector<32x256xf32>
      %c1_10 = arith.constant 1 : index
      %c0_11 = arith.constant 0 : index
      %22 = arith.index_cast %5 : i32 to index
      %23 = vector.load %arg2[%c1_10, %c0_11, %22] : memref<8x32x1024xbf16, #tpu.memory_space<vmem>>, vector<1x32x256xbf16>
      %24 = vector.shape_cast %23 : vector<1x32x256xbf16> to vector<32x256xbf16>
      %25 = arith.extf %24 : vector<32x256xbf16> to vector<32x256xf32>
      %c2_12 = arith.constant 2 : index
      %c0_13 = arith.constant 0 : index
      %26 = arith.index_cast %5 : i32 to index
      %27 = vector.load %arg2[%c2_12, %c0_13, %26] : memref<8x32x1024xbf16, #tpu.memory_space<vmem>>, vector<1x32x256xbf16>
      %28 = vector.shape_cast %27 : vector<1x32x256xbf16> to vector<32x256xbf16>
      %29 = arith.extf %28 : vector<32x256xbf16> to vector<32x256xf32>
      %c3 = arith.constant 3 : index
      %c0_14 = arith.constant 0 : index
      %30 = arith.index_cast %5 : i32 to index
      %31 = vector.load %arg2[%c3, %c0_14, %30] : memref<8x32x1024xbf16, #tpu.memory_space<vmem>>, vector<1x32x256xbf16>
      %32 = vector.shape_cast %31 : vector<1x32x256xbf16> to vector<32x256xbf16>
      %33 = arith.extf %32 : vector<32x256xbf16> to vector<32x256xf32>
      %c4 = arith.constant 4 : index
      %c0_15 = arith.constant 0 : index
      %34 = arith.index_cast %5 : i32 to index
      %35 = vector.load %arg2[%c4, %c0_15, %34] : memref<8x32x1024xbf16, #tpu.memory_space<vmem>>, vector<1x32x256xbf16>
      %36 = vector.shape_cast %35 : vector<1x32x256xbf16> to vector<32x256xbf16>
      %37 = arith.extf %36 : vector<32x256xbf16> to vector<32x256xf32>
      %c5 = arith.constant 5 : index
      %c0_16 = arith.constant 0 : index
      %38 = arith.index_cast %5 : i32 to index
      %39 = vector.load %arg2[%c5, %c0_16, %38] : memref<8x32x1024xbf16, #tpu.memory_space<vmem>>, vector<1x32x256xbf16>
      %40 = vector.shape_cast %39 : vector<1x32x256xbf16> to vector<32x256xbf16>
      %41 = arith.extf %40 : vector<32x256xbf16> to vector<32x256xf32>
      %c6 = arith.constant 6 : index
      %c0_17 = arith.constant 0 : index
      %42 = arith.index_cast %5 : i32 to index
      %43 = vector.load %arg2[%c6, %c0_17, %42] : memref<8x32x1024xbf16, #tpu.memory_space<vmem>>, vector<1x32x256xbf16>
      %44 = vector.shape_cast %43 : vector<1x32x256xbf16> to vector<32x256xbf16>
      %45 = arith.extf %44 : vector<32x256xbf16> to vector<32x256xf32>
      %c7 = arith.constant 7 : index
      %c0_18 = arith.constant 0 : index
      %46 = arith.index_cast %5 : i32 to index
      %47 = vector.load %arg2[%c7, %c0_18, %46] : memref<8x32x1024xbf16, #tpu.memory_space<vmem>>, vector<1x32x256xbf16>
      %48 = vector.shape_cast %47 : vector<1x32x256xbf16> to vector<32x256xbf16>
      %49 = arith.extf %48 : vector<32x256xbf16> to vector<32x256xf32>
      %50 = arith.subf %25, %21 : vector<32x256xf32>
      %51 = arith.mulf %9, %50 : vector<32x256xf32>
      %52 = arith.addf %21, %51 : vector<32x256xf32>
      %53 = arith.subf %33, %29 : vector<32x256xf32>
      %54 = arith.mulf %9, %53 : vector<32x256xf32>
      %55 = arith.addf %29, %54 : vector<32x256xf32>
      %56 = arith.subf %41, %37 : vector<32x256xf32>
      %57 = arith.mulf %9, %56 : vector<32x256xf32>
      %58 = arith.addf %37, %57 : vector<32x256xf32>
      %59 = arith.subf %49, %45 : vector<32x256xf32>
      %60 = arith.mulf %9, %59 : vector<32x256xf32>
      %61 = arith.addf %45, %60 : vector<32x256xf32>
      %62 = arith.subf %55, %52 : vector<32x256xf32>
      %63 = arith.mulf %13, %62 : vector<32x256xf32>
      %64 = arith.addf %52, %63 : vector<32x256xf32>
      %65 = arith.subf %61, %58 : vector<32x256xf32>
      %66 = arith.mulf %13, %65 : vector<32x256xf32>
      %67 = arith.addf %58, %66 : vector<32x256xf32>
      %68 = arith.subf %67, %64 : vector<32x256xf32>
      %69 = arith.mulf %17, %68 : vector<32x256xf32>
      %70 = arith.addf %64, %69 : vector<32x256xf32>
      %cst = arith.constant dense<0.000000e+00> : vector<8x256xf32>
      %71 = tpu.matmul %0, %70, %cst {dimension_numbers = #tpu.dot_dimension_numbers<[1], [0], [0], [1], [0, 0, 1, 1], [], []>} : vector<8x32xf32>, vector<32x256xf32>, vector<8x256xf32> -> vector<8x256xf32>
      %c0_19 = arith.constant 0 : index
      %72 = arith.index_cast %5 : i32 to index
      %73 = vector.load %arg4[%c0_19, %72] : memref<8x1024xf32, #tpu.memory_space<vmem>>, vector<8x256xf32>
      tpu.vector_store %arg4[%c0_19, %72], %71 {strides = array<i32>} : memref<8x1024xf32, #tpu.memory_space<vmem>>, vector<8x256xf32>,
    }
    %c4_i32_1 = arith.constant 4 : i32
    return
  }
  func.func @transform_0(%arg0: i32) -> (i32, i32, i32) {
    %c0_i32 = arith.constant 0 : i32
    %c0_i32_0 = arith.constant 0 : i32
    %c0_i32_1 = arith.constant 0 : i32
    return %c0_i32, %c0_i32_0, %arg0 : i32, i32, i32
  }
  func.func @transform_1(%arg0: i32) -> (i32, i32, i32) {
    %c0_i32 = arith.constant 0 : i32
    %c0_i32_0 = arith.constant 0 : i32
    %c0_i32_1 = arith.constant 0 : i32
    return %c0_i32, %c0_i32_0, %arg0 : i32, i32, i32
  }
  func.func @transform_2(%arg0: i32) -> (i32, i32) {
    %c0_i32 = arith.constant 0 : i32
    %c0_i32_0 = arith.constant 0 : i32
    %c0_i32_1 = arith.constant 0 : i32
    return %c0_i32, %c0_i32_0 : i32, i32
  }
  func.func @transform_3(%arg0: i32) -> (i32, i32) {
    %c0_i32 = arith.constant 0 : i32
    %c0_i32_0 = arith.constant 0 : i32
    return %c0_i32, %arg0 : i32, i32
  }
}

</mosaic_0001>

<bundles_post_ra>
// kernel: tpu_custom_call.1
= control target key start
LH: loop header
LB: loop body
LE: loop exit
PB: predicated region body
PF: predicated region fallthrough
CT: control target
= control target key end

     0   :  { %8 = vsyncpa [#allocation3], 0  ;;  %s938_s0 = inlined_call_operand.hbm [shape: f32[3,16,1000], index: 0, kind: input, shape index: {}]   ;;  %s939_s1 = inlined_call_operand.hbm [shape: bf16[8,32,1000], index: 1, kind: input, shape index: {}]   ;;  %s940_s2 = inlined_call_operand.hbm [shape: f32[8,32], index: 2, kind: input, shape index: {}]   ;;  %s941_s3 = inlined_call_operand.hbm [shape: f32[8,1000], index: 3, kind: output, shape index: {}]  }
   0x1   :  { %9 = vsyncpa [#allocation6], 0 }
   0x2   :  { %10 = vsyncpa [#allocation4], 0  ;;  %s664_s12 = smov [#allocation5]  }
   0x3   :  { %s28_s13 = sshll.u32 %s664_s12, 4  ;;  %s29_s13 = int_to_ptr.vmem [resolvable:$true] %s28_s13 }
   0x4   :  { %s578_s14 = scalar_lea.vmem %s29_s13, 16384  ;;  %p583_p1 = scmp.lt.s32.totalorder %s29_s13, %s29_s13 }
   0x5   :  { %p579_p0 = scmp.ne.s32.totalorder %s29_s13, %s578_s14  ;;  %p584_p2 = scmp.lt.s32.totalorder %s578_s14, %s578_s14 }
   0x7   :  { %p585_p3 = por %p584_p2, %p583_p1 }
   0x9   :  { %p586_p4 = pnand %p585_p3, %p579_p0 }
   0xb   :  { %589 = shalt.err (!%p586_p4)
}
   0xc   :  { %s665_s15 = smov 512   ;;  %s666_s16 = smov 32  }
   0xd   :  { %34 = dma.hbm_to_vmem [thread:$0]  %s939_s1, 16384, %s29_s13, [#allocation6], %s665_s15, %s665_s15, %s666_s16  }
   0xe   :  { %s667_s19 = smov [#allocation2]  }
   0xf   :  { %s16_s20 = sshll.u32 %s667_s19, 4  ;;  %s17_s20 = int_to_ptr.vmem [resolvable:$true] %s16_s20 }
  0x10   :  { %s598_s21 = scalar_lea.vmem %s17_s20, 6144  ;;  %p603_p6 = scmp.lt.s32.totalorder %s17_s20, %s17_s20 }
  0x11   :  { %p599_p5 = scmp.ne.s32.totalorder %s17_s20, %s598_s21  ;;  %p604_p7 = scmp.lt.s32.totalorder %s598_s21, %s598_s21 }
  0x13   :  { %p605_p8 = por %p604_p7, %p603_p6 }
  0x15   :  { %p606_p9 = pnand %p605_p8, %p599_p5 }
  0x17   :  { %609 = shalt.err (!%p606_p9)
}
  0x18   :  { %s668_s22 = smov 1024   ;;  %s669_s23 = smov 64  }
  0x19   :  { %22 = dma.hbm_to_vmem [thread:$0]  %s938_s0, 6144, %s17_s20, [#allocation3], %s668_s22, %s668_s22, %s669_s23  }
  0x1a   :  { %s670_s26 = smov [#allocation7]  }
  0x1b   :  { %s41_s27 = sshll.u32 %s670_s26, 4  ;;  %s42_s27 = int_to_ptr.vmem [resolvable:$true] %s41_s27 }
  0x1c   :  { %s618_s1 = scalar_lea.vmem %s42_s27, 128  ;;  %p623_p11 = scmp.lt.s32.totalorder %s42_s27, %s42_s27 }
  0x1d   :  { %p619_p10 = scmp.ne.s32.totalorder %s42_s27, %s618_s1  ;;  %p624_p12 = scmp.lt.s32.totalorder %s618_s1, %s618_s1 }
  0x1f   :  { %p625_p13 = por %p624_p12, %p623_p11 }
  0x21   :  { %p626_p0 = pnand %p625_p13, %p619_p10 }
  0x23   :  { %629 = shalt.err (!%p626_p0)
}
  0x24   :  { %44 = dma.hbm_to_vmem [thread:$0]  %s940_s2, 128, %s42_s27, [#allocation6]  }
  0x25   :  { %654 = dma.done.wait [#allocation3], 6144  }
  0x26   :  { %655 = vsyncadd [#allocation3], 4294961152 }
  0x27   :  { %656 = dma.done.wait [#allocation6], 16512  }
  0x28   :  { %657 = vsyncadd [#allocation6], 4294950784  ;;  %v702_v0 = vld [vmem:[#allocation7] sm:$0xff]  ;;  %s704_s0 = smov 0  }
  0x29 LB: > { %v671_v1 = vmov 0.0   ;;  %s503_s30 = sshll.u32 %s662_s0, 8  ;;  %vm370_vm0 = vcmask 261120   ;;  %s60_s0 = sadd.s32 1, %s662_s0   ;;  %s662_s0 = sphi %s704_s0, %s60_s0  }
  0x2a   : > { %438 = vmatprep.mubr.f32.mxu0 %v671_v1  ;;  %s710_s4 = sshra.s32 %s503_s30, 7  ;;  %p57_p1 = scmp.ge.s32.totalorder %s60_s0, 4  }
  0x2b   : > { %s504_s2 = sshll.u32 %s710_s4, 3  ;;  %s515_s5 = sshll.u32 %s710_s4, 2 }
  0x2c   : > { %s714_s6 = scalar_lea.vmem [#allocation5], %s515_s5  ;;  %s727_s7 = scalar_lea.vmem [#allocation2], %s504_s2 }
  0x2d   : > { %v717_v2 = vld [vmem:[%s714_s6 + $0x20] sm:$0xff]  ;;  %v69_v5 = vld [vmem:[%s727_s7 + $0x48] sm:$0xff]  ;;  %s446_s8 = scalar_lea.vmem [#allocation8], %s504_s2  ;;  %s672_s9 = smov (%p57_p1), [#allocation8]  }
  0x2e   : > { %v720_v3 = vld [vmem:[%s714_s6 + $0x60] sm:$0xff]  ;;  %v93_v6 = vunpack.c.h.bf16 %v717_v2  ;;  %v92_v18 = vunpack.c.l.bf16 %v717_v2  ;;  %v509_v58 = vld [vmem:[%s727_s7 + $0xc8] sm:$0xff]  ;;  %s455_s10 = sshll.u32 (%p57_p1), %s672_s9, 4  ;;  %s456_s10 = int_to_ptr.vmem [resolvable:$true] %s455_s10 }
  0x2f   : > { %v723_v4 = vld [vmem:[%s714_s6 + $0xa0] sm:$0xff]  ;;  %v97_v7 = vunpack.c.h.bf16 %v720_v3  ;;  %v96_v53 = vunpack.c.l.bf16 %v720_v3  ;;  %s630_s11 = scalar_lea.vmem (%p57_p1), %s456_s10, 1024  ;;  %p635_p3 = scmp.lt.s32.totalorder (%p57_p1), %s456_s10, %s456_s10 }
  0x30   : > { %v733_v8 = vld [vmem:[%s714_s6 + $0xe0] sm:$0xff]  ;;  %v107_v9 = vunpack.c.h.bf16 %v723_v4  ;;  %v106_v57 = vunpack.c.l.bf16 %v723_v4  ;;  %p631_p2 = scmp.ne.s32.totalorder (%p57_p1), %s456_s10, %s630_s11  ;;  %p636_p4 = scmp.lt.s32.totalorder (%p57_p1), %s630_s11, %s630_s11 }
  0x31   : > { %v737_v10 = vld [vmem:[%s714_s6 + $0x120] sm:$0xff]  ;;  %v111_v12 = vunpack.c.h.bf16 %v733_v8  ;;  %v110_v62 = vunpack.c.l.bf16 %v733_v8 }
  0x32   : > { %v740_v11 = vld [vmem:[%s714_s6 + $0x160] sm:$0xff]  ;;  %v122_v13 = vunpack.c.h.bf16 %v737_v10  ;;  %v205_v25 = vsub.f32 %v107_v9, %v93_v6  ;;  %p637_p5 = por (%p57_p1), %p636_p4, %p635_p3 }
  0x33   : > { %v126_v14 = vunpack.c.h.bf16 %v740_v11  ;;  %v746_v15 = vld [vmem:[%s714_s6 + $0x1a0] sm:$0xff]  ;;  %v209_v32 = vsub.f32 %v111_v12, %v97_v7  ;;  %v125_v12 = vunpack.c.l.bf16 %v740_v11 }
  0x34   : > { %v749_v16 = vld [vmem:[%s714_s6 + $0x1e0] sm:$0xff]  ;;  %v137_v19 = vunpack.c.h.bf16 %v746_v15  ;;  %v213_v37 = vmul.f32 %v205_v25, %v69_v5  ;;  %v136_v3 = vunpack.c.l.bf16 %v746_v15  ;;  %p638_p6 = pnand (%p57_p1), %p637_p5, %p631_p2 }
  0x35   : > { %v752_v17 = vld [vmem:[%s714_s6 + $0x220] sm:$0xff]  ;;  %v141_v20 = vunpack.c.h.bf16 %v749_v16  ;;  %v217_v39 = vmul.f32 %v209_v32, %v69_v5 }
  0x36   : > { %v758_v21 = vld [vmem:[%s714_s6 + $0x260] sm:$0xff]  ;;  %v152_v22 = vunpack.c.h.bf16 %v752_v17  ;;  %v229_v40 = vsub.f32 %v137_v19, %v122_v13  ;;  %v221_v42 = vadd.f32 %v213_v37, %v93_v6  ;;  %v151_v19 = vunpack.c.l.bf16 %v752_v17 }
  0x37   : > { %v762_v23 = vld [vmem:[%s714_s6 + $0x2a0] sm:$0xff]  ;;  %v156_v26 = vunpack.c.h.bf16 %v758_v21  ;;  %v233_v41 = vsub.f32 %v141_v20, %v126_v14  ;;  %v225_v46 = vadd.f32 %v217_v39, %v97_v7  ;;  %v121_v7 = vunpack.c.l.bf16 %v737_v10 }
  0x38   : > { %v765_v24 = vld [vmem:[%s714_s6 + $0x2e0] sm:$0xff]  ;;  %v167_v27 = vunpack.c.h.bf16 %v762_v23  ;;  %v237_v47 = vmul.f32 %v229_v40, %v69_v5  ;;  %v155_v8 = vunpack.c.l.bf16 %v758_v21  ;;  %v204_v21 = vsub.f32 %v106_v57, %v92_v18 }
  0x39   : > { %v171_v28 = vunpack.c.h.bf16 %v765_v24  ;;  %v771_v29 = vld [vmem:[%s714_s6 + $0x320] sm:$0xff]  ;;  %v241_v48 = vmul.f32 %v233_v41, %v69_v5  ;;  %v170_v10 = vunpack.c.l.bf16 %v765_v24  ;;  %v228_v24 = vsub.f32 %v136_v3, %v121_v7 }
  0x3a   : > { %v774_v30 = vld [vmem:[%s714_s6 + $0x360] sm:$0xff]  ;;  %v182_v33 = vunpack.c.h.bf16 %v771_v29  ;;  %v253_v43 = vsub.f32 %v167_v27, %v152_v22  ;;  %v245_v54 = vadd.f32 %v237_v47, %v122_v13  ;;  %v181_v15 = vunpack.c.l.bf16 %v771_v29 }
  0x3b   : > { %v777_v31 = vld [vmem:[%s714_s6 + $0x3a0] sm:$0xff]  ;;  %v186_v34 = vunpack.c.h.bf16 %v774_v30  ;;  %v257_v44 = vsub.f32 %v171_v28, %v156_v26  ;;  %v249_v55 = vadd.f32 %v241_v48, %v126_v14  ;;  %v185_v28 = vunpack.c.l.bf16 %v774_v30 }
  0x3c   : > { %v782_v35 = vld [vmem:[%s714_s6 + $0x3e0] sm:$0xff]  ;;  %v197_v36 = vunpack.c.h.bf16 %v777_v31  ;;  %v261_v50 = vmul.f32 %v253_v43, %v69_v5  ;;  %v301_v1 = vsub.f32 %v245_v54, %v221_v42  ;;  %v196_v17 = vunpack.c.l.bf16 %v777_v31 }
  0x3d   : > { %v201_v38 = vunpack.c.h.bf16 %v782_v35  ;;  %v265_v51 = vmul.f32 %v257_v44, %v69_v5  ;;  %v305_v6 = vsub.f32 %v249_v55, %v225_v46  ;;  %v68_v27 = vld [vmem:[%s727_s7 + $0x40] sm:$0xff] }
  0x3e   : > { %v277_v45 = vsub.f32 %v197_v36, %v182_v33  ;;  %v269_v59 = vadd.f32 %v261_v50, %v152_v22  ;;  %v309_v4 = vmul.f32 %v509_v58, %v301_v1  ;;  %v166_v22 = vunpack.c.l.bf16 %v762_v23  ;;  %v817_v44 = vld [vmem:[%s714_s6 + $0x40] sm:$0xff] }
  0x3f   : > { %v281_v49 = vsub.f32 %v201_v38, %v186_v34  ;;  %v273_v60 = vadd.f32 %v265_v51, %v156_v26  ;;  %v313_v13 = vmul.f32 %v509_v58, %v305_v6  ;;  %v208_v23 = vsub.f32 %v110_v62, %v96_v53  ;;  %v824_v50 = vld [vmem:[%s714_s6 + $0x140] sm:$0xff] }
  0x40   : > { %v285_v52 = vmul.f32 %v277_v45, %v69_v5  ;;  %v798_v25 = vadd.f32 %v309_v4, %v221_v42  ;;  %v200_v36 = vunpack.c.l.bf16 %v782_v35  ;;  %v212_v29 = vmul.f32 %v204_v21, %v68_v27  ;;  %v508_v51 = vld [vmem:[%s727_s7 + $0xc0] sm:$0xff] }
  0x41   : > { %v289_v56 = vmul.f32 %v281_v49, %v69_v5  ;;  %v140_v5 = vunpack.c.l.bf16 %v749_v16  ;;  %v321_v11 = vadd.f32 %v313_v13, %v225_v46  ;;  %v252_v37 = vsub.f32 %v166_v22, %v151_v19  ;;  %v821_v49 = vld [vmem:[%s714_s6 + $0xc0] sm:$0xff] }
  0x42   : > { %v293_v61 = vadd.f32 %v285_v52, %v182_v33  ;;  %v256_v38 = vsub.f32 %v170_v10, %v155_v8  ;;  %v216_v31 = vmul.f32 %v208_v23, %v68_v27  ;;  %v236_v39 = vmul.f32 %v228_v24, %v68_v27  ;;  %v529_v55 = vld [vmem:[%s714_s6 + $0x1c0] sm:$0xff] }
  0x43   : > { %v297_v63 = vadd.f32 %v289_v56, %v186_v34  ;;  %v232_v33 = vsub.f32 %v140_v5, %v125_v12  ;;  %v809_v34 = vld [vmem:[%s727_s7 + $0x148] sm:$0xff]  ;;  %v220_v42 = vadd.f32 %v212_v29, %v92_v18  ;;  %v260_v43 = vmul.f32 %v252_v37, %v68_v27  ;;  %v829_v56 = vld [vmem:[%s714_s6 + $0x240] sm:$0xff] }
  0x44   : > { %v325_v9 = vsub.f32 %v293_v61, %v269_v59  ;;  %v264_v35 = vmul.f32 %v256_v38, %v68_v27  ;;  %v224_v46 = vadd.f32 %v216_v31, %v96_v53  ;;  %v244_v47 = vadd.f32 %v236_v39, %v121_v7  ;;  %v834_v61 = vld [vmem:[%s714_s6 + $0x340] sm:$0xff] }
  0x45   : > { %v329_v14 = vsub.f32 %v297_v63, %v273_v60  ;;  %v240_v40 = vmul.f32 %v232_v33, %v68_v27  ;;  %v268_v2 = vadd.f32 %v260_v43, %v151_v19  ;;  %v276_v52 = vsub.f32 %v196_v17, %v181_v15  ;;  %v549_v7 = vld [vmem:[%s714_s6 + $0x3c0] sm:$0xff] }
  0x46   : > { %v333_v20 = vmul.f32 %v509_v58, %v325_v9  ;;  %v272_v18 = vadd.f32 %v264_v35, %v155_v8  ;;  %v280_v54 = vsub.f32 %v200_v36, %v185_v28  ;;  %v109_v1 = vunpack.c.h.bf16 %v821_v49  ;;  %v513_v35 = vld [vmem:[%s727_s7 + $0x140] sm:$0xff] }
  0x47   : > { %v337_v26 = vmul.f32 %v509_v58, %v329_v14  ;;  %v248_v48 = vadd.f32 %v240_v40, %v125_v12  ;;  %v300_v58 = vsub.f32 %v244_v47, %v220_v42  ;;  %v284_v62 = vmul.f32 %v276_v52, %v68_v27  ;;  %v841_v14 = vld [vmem:[%s727_s7 + $0x8] sm:$0xff] }
  0x48   : > { %v801_v16 = vadd.f32 %v333_v20, %v269_v59  ;;  %v95_v59 = vunpack.c.h.bf16 %v817_v44  ;;  %v288_v63 = vmul.f32 %v280_v54, %v68_v27  ;;  %v124_v6 = vunpack.c.h.bf16 %v824_v50 }
  0x49   : > { %v345_v32 = vadd.f32 %v337_v26, %v273_v60  ;;  %v304_v53 = vsub.f32 %v248_v48, %v224_v46  ;;  %v539_v60 = vld [vmem:[%s714_s6 + $0x2c0] sm:$0xff]  ;;  %v308_v9 = vmul.f32 %v508_v51, %v300_v58  ;;  %v139_v3 = vunpack.c.h.bf16 %v529_v55 }
  0x4a   : > { %v349_v41 = vsub.f32 %v801_v16, %v798_v25  ;;  %v154_v5 = vunpack.c.h.bf16 %v829_v56  ;;  %v292_v4 = vadd.f32 %v284_v62, %v181_v15  ;;  %v296_v13 = vadd.f32 %v288_v63, %v185_v28  ;;  %v876_v16 = vld [vmem:[%s714_s6 + $0x80] sm:$0xff] }
  0x4b   : > { %v353_v30 = vsub.f32 %v345_v32, %v321_v11  ;;  %v312_v12 = vmul.f32 %v508_v51, %v304_v53  ;;  %v169_v19 = vunpack.c.h.bf16 %v539_v60  ;;  %v184_v20 = vunpack.c.h.bf16 %v834_v61 }
  0x4c   : > { %v844_v8 = vadd.f32 %v308_v9, %v220_v42  ;;  %v199_v10 = vunpack.c.h.bf16 %v549_v7  ;;  %v324_v26 = vsub.f32 %v292_v4, %v268_v2  ;;  %v328_v27 = vsub.f32 %v296_v13, %v272_v18  ;;  %v882_v9 = vld [vmem:[%s714_s6 + $0x100] sm:$0xff] }
  0x4d   : > { %v361_v45 = vmul.f32 %v809_v34, %v353_v30  ;;  %v320_v22 = vadd.f32 %v312_v12, %v224_v46  ;;  %v231_v17 = vsub.f32 %v139_v3, %v124_v6  ;;  %v255_v21 = vsub.f32 %v169_v19, %v154_v5  ;;  %v527_v12 = vld [vmem:[%s714_s6 + $0x180] sm:$0xff] }
  0x4e   : > { %v279_v23 = vsub.f32 %v199_v10, %v184_v20  ;;  %v94_v15 = vunpack.c.l.bf16 %v817_v44  ;;  %v108_v28 = vunpack.c.l.bf16 %v821_v49  ;;  %v332_v24 = vmul.f32 %v508_v51, %v324_v26  ;;  %v855_v44 = vld [vmem:[%s727_s7 + $0x88] sm:$0xff]  ;;  %v886_v19 = vld [vmem:[%s714_s6 + $0x200] sm:$0xff] }
  0x4f   : > { %v369_v57 = vadd.f32 %v361_v45, %v321_v11  ;;  %v207_v11 = vsub.f32 %v109_v1, %v95_v59  ;;  %v336_v33 = vmul.f32 %v508_v51, %v328_v27  ;;  %v239_v36 = vmul.f32 %v231_v17, %v841_v14  ;;  %v873_v1 = vld [vmem:[%s714_s6] sm:$0xff] }
  0x50   : > { %v263_v29 = vmul.f32 %v255_v21, %v841_v14  ;;  %v287_v38 = vmul.f32 %v279_v23, %v841_v14  ;;  %v123_v30 = vunpack.c.l.bf16 %v824_v50  ;;  %v138_v31 = vunpack.c.l.bf16 %v529_v55  ;;  %v861_v50 = vld [vmem:[%s727_s7] sm:$0xff] }
  0x51   : > { %398 = vmatprep.subr.mxu0 %v369_v57  ;;  %v215_v32 = vmul.f32 %v207_v11, %v841_v14  ;;  %v340_v39 = vadd.f32 %v332_v24, %v268_v2  ;;  %v344_v40 = vadd.f32 %v336_v33, %v272_v18  ;;  %v247_v42 = vadd.f32 %v239_v36, %v124_v6  ;;  %v890_v10 = vld [vmem:[%s714_s6 + $0x300] sm:$0xff]  ;;  %v893_v11 = vld [vmem:[%s727_s7 + $0x108] sm:$0xff] }
  0x52   : > { %v271_v43 = vadd.f32 %v263_v29, %v154_v5  ;;  %v295_v45 = vadd.f32 %v287_v38, %v184_v20  ;;  %v153_v46 = vunpack.c.l.bf16 %v829_v56  ;;  %v168_v47 = vunpack.c.l.bf16 %v539_v60  ;;  %v537_v20 = vld [vmem:[%s714_s6 + $0x280] sm:$0xff] }
  0x53   : > { %v223_v37 = vadd.f32 %v215_v32, %v95_v59  ;;  %v183_v48 = vunpack.c.l.bf16 %v834_v61  ;;  %v348_v49 = vsub.f32 %v340_v39, %v844_v8  ;;  %v352_v51 = vsub.f32 %v344_v40, %v320_v22  ;;  %v547_v32 = vld [vmem:[%s714_s6 + $0x380] sm:$0xff] }
  0x54   : > { %v198_v2 = vunpack.c.l.bf16 %v549_v7  ;;  %v327_v18 = vsub.f32 %v295_v45, %v271_v43  ;;  %v206_v54 = vsub.f32 %v108_v28, %v94_v15  ;;  %v230_v55 = vsub.f32 %v138_v31, %v123_v30 }
  0x55   : > { %v303_v52 = vsub.f32 %v247_v42, %v223_v37  ;;  %v254_v57 = vsub.f32 %v168_v47, %v153_v46  ;;  %v357_v56 = vmul.f32 %v809_v34, %v349_v41  ;;  %v360_v58 = vmul.f32 %v513_v35, %v352_v51 }
  0x56   : > { %v278_v59 = vsub.f32 %v198_v2, %v183_v48  ;;  %v335_v60 = vmul.f32 %v855_v44, %v327_v18  ;;  %v214_v61 = vmul.f32 %v206_v54, %v861_v50  ;;  %v238_v62 = vmul.f32 %v230_v55, %v861_v50  ;;  %v511_v2 = vld [vmem:[%s727_s7 + $0x100] sm:$0xff] }
  0x57   : > { %v311_v53 = vmul.f32 %v855_v44, %v303_v52  ;;  %v262_v63 = vmul.f32 %v254_v57, %v861_v50  ;;  %v878_v34 = vmul.f32 %v513_v35, %v348_v49  ;;  %v368_v41 = vadd.f32 %v360_v58, %v320_v22  ;;  %v896_v22 = vld [vmem:[%s727_s7 + $0x80] sm:$0xff] }
  0x58   : > { %v286_v7 = vmul.f32 %v278_v59, %v861_v50  ;;  %v343_v3 = vadd.f32 %v335_v60, %v271_v43  ;;  %v222_v5 = vadd.f32 %v214_v61, %v94_v15  ;;  %v246_v4 = vadd.f32 %v238_v62, %v123_v30 }
  0x59   : > { %v319_v6 = vadd.f32 %v311_v53, %v223_v37  ;;  %v270_v13 = vadd.f32 %v262_v63, %v153_v46  ;;  %399 = vmatpush1.msra.mxu0 %v368_v41  ;;  %v365_v27 = vadd.f32 %v357_v56, %v798_v25  ;;  %v91_v17 = vunpack.c.h.bf16 %v873_v1 }
  0x5a   : > { %v294_v26 = vadd.f32 %v286_v7, %v183_v48  ;;  %v105_v21 = vunpack.c.h.bf16 %v876_v16  ;;  %v302_v15 = vsub.f32 %v246_v4, %v222_v5  ;;  %v120_v28 = vunpack.c.h.bf16 %v882_v9 }
  0x5b   : > { %v351_v23 = vsub.f32 %v343_v3, %v319_v6  ;;  %v135_v24 = vunpack.c.h.bf16 %v527_v12  ;;  %v150_v36 = vunpack.c.h.bf16 %v886_v19  ;;  %v165_v29 = vunpack.c.h.bf16 %v537_v20 }
  0x5c   : > { %v326_v33 = vsub.f32 %v294_v26, %v270_v13  ;;  %v180_v37 = vunpack.c.h.bf16 %v890_v10  ;;  %v310_v25 = vmul.f32 %v896_v22, %v302_v15  ;;  %v195_v30 = vunpack.c.h.bf16 %v547_v32 }
  0x5d   : > { %v359_v38 = vmul.f32 %v893_v11, %v351_v23  ;;  %v203_v31 = vsub.f32 %v105_v21, %v91_v17  ;;  %v227_v40 = vsub.f32 %v135_v24, %v120_v28  ;;  %v251_v42 = vsub.f32 %v165_v29, %v150_v36 }
  0x5e   : > { %v334_v39 = vmul.f32 %v896_v22, %v326_v33  ;;  %v90_v43 = vunpack.c.l.bf16 %v873_v1  ;;  %v318_v45 = vadd.f32 %v310_v25, %v222_v5  ;;  %v275_v47 = vsub.f32 %v195_v30, %v180_v37 }
  0x5f   : > { %v367_v35 = vadd.f32 %v359_v38, %v319_v6  ;;  %v211_v46 = vmul.f32 %v203_v31, %v841_v14  ;;  %v235_v49 = vmul.f32 %v227_v40, %v841_v14  ;;  %v259_v51 = vmul.f32 %v251_v42, %v841_v14 }
  0x60   : > { %v342_v48 = vadd.f32 %v334_v39, %v270_v13  ;;  %v104_v52 = vunpack.c.l.bf16 %v876_v16  ;;  %v283_v54 = vmul.f32 %v275_v47, %v841_v14  ;;  %v119_v55 = vunpack.c.l.bf16 %v882_v9 }
  0x61   : > { %400 = vmatprep.subr.mxu0 %v367_v35  ;;  %v219_v18 = vadd.f32 %v211_v46, %v91_v17  ;;  %v134_v57 = vunpack.c.l.bf16 %v527_v12  ;;  %v243_v58 = vadd.f32 %v235_v49, %v120_v28  ;;  %v267_v53 = vadd.f32 %v259_v51, %v150_v36 }
  0x62   : > { %v350_v56 = vsub.f32 %v342_v48, %v318_v45  ;;  %v149_v59 = vunpack.c.l.bf16 %v886_v19  ;;  %v291_v60 = vadd.f32 %v283_v54, %v180_v37  ;;  %v164_v61 = vunpack.c.l.bf16 %v537_v20 }
  0x63   : > { %v179_v62 = vunpack.c.l.bf16 %v890_v10  ;;  %v194_v63 = vunpack.c.l.bf16 %v547_v32  ;;  %v299_v16 = vsub.f32 %v243_v58, %v219_v18  ;;  %v202_v41 = vsub.f32 %v104_v52, %v90_v43 }
  0x64   : > { %v358_v1 = vmul.f32 %v511_v2, %v350_v56  ;;  %v226_v6 = vsub.f32 %v134_v57, %v119_v55  ;;  %v364_v14 = vadd.f32 %v878_v34, %v844_v8  ;;  %v323_v7 = vsub.f32 %v291_v60, %v267_v53 }
  0x65   : > { %v250_v9 = vsub.f32 %v164_v61, %v149_v59  ;;  %v274_v12 = vsub.f32 %v194_v63, %v179_v62  ;;  %v307_v5 = vmul.f32 %v855_v44, %v299_v16  ;;  %v210_v4 = vmul.f32 %v202_v41, %v861_v50 }
  0x66   : > { %v366_v3 = vadd.f32 %v358_v1, %v318_v45  ;;  %v234_v13 = vmul.f32 %v226_v6, %v861_v50  ;;  %v331_v19 = vmul.f32 %v855_v44, %v323_v7 }
  0x67   : > { %v258_v20 = vmul.f32 %v250_v9, %v861_v50  ;;  %v282_v10 = vmul.f32 %v274_v12, %v861_v50  ;;  %v315_v26 = vadd.f32 %v307_v5, %v219_v18  ;;  %v218_v17 = vadd.f32 %v210_v4, %v90_v43 }
  0x68   : > { %401 = vmatpush1.msra.mxu0 %v366_v3  ;;  %v242_v8 = vadd.f32 %v234_v13, %v119_v55  ;;  %v339_v34 = vadd.f32 %v331_v19, %v267_v53 }
  0x69   : > { %402 = vmatprep.subr.mxu0 %v365_v27  ;;  %v266_v21 = vadd.f32 %v258_v20, %v149_v59  ;;  %v290_v32 = vadd.f32 %v282_v10, %v179_v62 }
  0x6a   : > { %403 = vmatpush1.msra.mxu0 %v364_v14  ;;  %v298_v23 = vsub.f32 %v242_v8, %v218_v17  ;;  %v347_v15 = vsub.f32 %v339_v34, %v315_v26 }
  0x6b   : > { %v322_v28 = vsub.f32 %v290_v32, %v266_v21 }
  0x6c   : > { %v306_v24 = vmul.f32 %v896_v22, %v298_v23  ;;  %v355_v44 = vmul.f32 %v893_v11, %v347_v15 }
  0x6d   : > { %v330_v33 = vmul.f32 %v896_v22, %v322_v28 }
  0x6e   : > { %v314_v50 = vadd.f32 %v306_v24, %v218_v17  ;;  %v363_v36 = vadd.f32 %v355_v44, %v315_v26 }
  0x6f   : > { %v338_v29 = vadd.f32 %v330_v33, %v266_v21 }
  0x70   : > { %404 = vmatprep.subr.mxu0 %v363_v36 }
  0x71   : > { %v346_v37 = vsub.f32 %v338_v29, %v314_v50 }
  0x73   : > { %v354_v27 = vmul.f32 %v511_v2, %v346_v37 }
  0x75   : > { %v362_v38 = vadd.f32 %v354_v27, %v314_v50 }
  0x77   : > { %405 = vmatpush1.msra.mxu0 %v362_v38 }
  0x78   : > { %551 = vmatmul.mubr.msk.f32.vlgmr.msra.gmra.mxu0 %vm370_vm0, %v702_v0 }
 0x137   :  { %59 = sbr.rel (!%p57_p1) target bundleno = 41 (0x29), region = 63 }
 0x138   : > { %v440_v25 = vpop.f32.mrf.mxu0 }
 0x139   : > { %447 = vst [vmem:[%s446_s8] sm:$0xff] %v440_v25 }
 0x13a   : > { %v442_v30 = vpop.f32.mrf.mxu0 }
 0x13b   : > { %448 = vst [vmem:[%s446_s8 + $0x8] sm:$0xff] %v442_v30 }
 0x13c   :  { %641 = shalt.err (!%p638_p6)
}
 0x13d   :  { %458 = dma.vmem_to_hbm [thread:$0]  %s456_s10, 1024, %s941_s3, [#allocation4]  }
 0x13e   :  { %658 = dma.done.wait [#allocation4], 1024  }
 0x13f   :  { %659 = vsyncadd [#allocation4], 4294966272 }
 0x140   :  { %462 = vsyncpa [#allocation3], 1 }
 0x141   :  { %463 = vsyncpa [#allocation6], 1 }
 0x142   :  { %464 = vsyncpa [#allocation4], 1 }

</bundles_post_ra>
